<compile_context>
chip_gen: v7x
topology: tpu7x:2x2x1
jax: 0.10.0
libtpu: 0.0.40
codegen_flags: <defaults>
</compile_context>

<pallas_src>
import functools

import jax
import jax.numpy as jnp
from jax.experimental import pallas as pl
from jax.experimental.pallas import tpu as pltpu


# -----------------------------------------------------------------------------
# Config
# -----------------------------------------------------------------------------
class Config:
    batch = 2
    fmri_dim = 64
    hidden = 32
    z_size = 32
    C, H, W = 4, 16, 16
    img_flat = C * H * W          # 1024
    disc_feat = 64
    rows = 8                      # batch padded to one full sublane


# -----------------------------------------------------------------------------
# Fused Pallas kernel: entire training forward (mode='vae', stage=1)
# -----------------------------------------------------------------------------
def _fused_forward_kernel(
    # inputs
    fmri_ref, gtx_ref, eps_ref, zp_ref,
    w_eh_ref, b_eh_ref,          # encoder hidden
    w_em_ref, b_em_ref,          # fused [mu | logvar] head
    w_dec_ref, b_dec_ref,        # decoder
    w_df_ref, b_df_ref,          # discriminator feature layer
    w_dc_ref, b_dc_ref,          # discriminator classifier (stored as (1, F))
    # outputs
    mulv_ref, xt_ref, dlayer_ref, dclass_ref,
    *, z_size,
):
    bf16 = jnp.bfloat16
    f32 = jnp.float32
    rows = fmri_ref.shape[0]

    # ---- encoder: fmri -> relu(hidden) ----
    h = jnp.dot(fmri_ref[...].astype(bf16), w_eh_ref[...],
                preferred_element_type=f32) + b_eh_ref[...]
    h = jnp.maximum(h, 0.0)

    # ---- fused mu | logvar head (64 lanes, one matmul) ----
    mlv = jnp.dot(h.astype(bf16), w_em_ref[...],
                  preferred_element_type=f32) + b_em_ref[...]
    mulv_ref[...] = mlv
    mu = mlv[:, :z_size]
    lv = mlv[:, z_size:]

    # ---- reparameterize: z = eps * exp(0.5 * logvar) + mu  (f32, EUP exp) ----
    z = eps_ref[...] * jnp.exp(0.5 * lv) + mu

    # ---- decoder on stacked [z ; z_p] -> sigmoid (flat images) ----
    zz = jnp.concatenate([z, zp_ref[...]], axis=0)             # (2*rows, Z)
    dec = jax.nn.sigmoid(
        jnp.dot(zz.astype(bf16), w_dec_ref[...], preferred_element_type=f32)
        + b_dec_ref[...])                                       # (2*rows, 1024)
    x_tilde = dec[:rows]
    x_p = dec[rows:]
    xt_ref[...] = x_tilde

    # ---- discriminator feature layer, computed ONCE on [gt ; x~ ; x_p] ----
    batch = jnp.concatenate([gtx_ref[...], x_tilde, x_p], axis=0)   # (3*rows, 1024)
    feat = jnp.dot(batch.astype(bf16), w_df_ref[...],
                   preferred_element_type=f32) + b_df_ref[...]
    feat = jnp.maximum(feat, 0.0)
    dlayer_ref[...] = feat[: 2 * rows]                          # 'REC' features

    # ---- discriminator class prob ('GAN'): lane reduction + sigmoid ----
    cls = jnp.sum(feat * w_dc_ref[...], axis=-1, keepdims=True) + b_dc_ref[...]
    dclass_ref[...] = jax.nn.sigmoid(cls)                       # (3*rows, 1)


def fused_forward_call(inputs, cfg):
    """Single pallas_call for the whole forward (everything VMEM-resident)."""
    rows = cfg.rows
    vmem = pl.BlockSpec(memory_space=pltpu.MemorySpace.VMEM)
    kernel = functools.partial(_fused_forward_kernel, z_size=cfg.z_size)
    out_shapes = (
        jax.ShapeDtypeStruct((rows, 2 * cfg.z_size), jnp.float32),      # [mu|lv]
        jax.ShapeDtypeStruct((rows, cfg.img_flat), jnp.float32),        # x_tilde
        jax.ShapeDtypeStruct((2 * rows, cfg.disc_feat), jnp.float32),   # disc_layer
        jax.ShapeDtypeStruct((3 * rows, 1), jnp.float32),               # disc_class
    )
    return pl.pallas_call(
        kernel,
        out_shape=out_shapes,
        in_specs=[vmem] * len(inputs),
        out_specs=tuple([vmem] * len(out_shapes)),
    )(*inputs)


# -----------------------------------------------------------------------------
# Parameter setup (glue)
# -----------------------------------------------------------------------------
def init_params(key, cfg):
    ks = jax.random.split(key, 12)
    s = 0.05

    def lin(kw, kb, din, dout):
        w = s * jax.random.normal(kw, (din, dout), jnp.float32)
        b = s * jax.random.normal(kb, (1, dout), jnp.float32)
        return w, b

    enc_h = lin(ks[0], ks[1], cfg.fmri_dim, cfg.hidden)
    enc_mu = lin(ks[2], ks[3], cfg.hidden, cfg.z_size)
    enc_lv = lin(ks[4], ks[5], cfg.hidden, cfg.z_size)
    dec = lin(ks[6], ks[7], cfg.z_size, cfg.img_flat)
    dis_f = lin(ks[8], ks[9], cfg.img_flat, cfg.disc_feat)
    dis_c = lin(ks[10], ks[11], cfg.disc_feat, 1)

    bf16 = jnp.bfloat16
    p = {
        # matmul weights in bf16 (halves DMA; MXU-native), biases stay f32
        "enc_h": (enc_h[0].astype(bf16), enc_h[1]),
        # fused [mu | logvar] head
        "enc_mlv": (jnp.concatenate([enc_mu[0], enc_lv[0]], axis=1).astype(bf16),
                    jnp.concatenate([enc_mu[1], enc_lv[1]], axis=1)),
        "dec": (dec[0].astype(bf16), dec[1]),
        "dis_f": (dis_f[0].astype(bf16), dis_f[1]),
        # classifier kept f32 and pre-transposed to (1, F) for a lane reduction
        "dis_c": (dis_c[0].reshape(1, cfg.disc_feat), dis_c[1].reshape(1, 1)),
    }
    return p


# -----------------------------------------------------------------------------
# Forward (wrapper glue: padding, RNG draws, boundary reshapes, slicing)
# -----------------------------------------------------------------------------
def vae_gan_cognitive_forward(params, sample, key, cfg):
    """Training forward, mode='vae', stage=1 (no teacher)."""
    x = sample["fmri"]           # (N, D_fmri)
    gt_x = sample["image"]       # (N, C, H, W)  NCHW
    n = x.shape[0]
    rows = cfg.rows
    pad = rows - n

    fmri_p = jnp.pad(x, ((0, pad), (0, 0)))
    gtx_flat_p = jnp.pad(gt_x.reshape(n, cfg.img_flat), ((0, pad), (0, 0)))

    k_eps, k_zp = jax.random.split(key)
    eps = jax.random.normal(k_eps, (rows, cfg.z_size), jnp.float32)
    z_p = jax.random.normal(k_zp, (rows, cfg.z_size), jnp.float32)

    inputs = (
        fmri_p, gtx_flat_p, eps, z_p,
        *params["enc_h"], *params["enc_mlv"],
        *params["dec"], *params["dis_f"], *params["dis_c"],
    )
    mulv, xt_flat, dlayer, dclass = fused_forward_call(inputs, cfg)

    mus = mulv[:n, :cfg.z_size]
    log_variances = mulv[:n, cfg.z_size:]
    x_tilde = xt_flat[:n].reshape(n, cfg.C, cfg.H, cfg.W)        # NCHW boundary
    # un-pad the discriminator outputs (kernel batch layout is padded blocks)
    disc_layer = jnp.concatenate([dlayer[0:n], dlayer[rows:rows + n]], axis=0)
    disc_class = jnp.concatenate(
        [dclass[0:n], dclass[rows:rows + n], dclass[2 * rows:2 * rows + n]],
        axis=0)

    return gt_x, x_tilde, disc_class, disc_layer, mus, log_variances


# -----------------------------------------------------------------------------
if __name__ == "__main__":
    cfg = Config()
    root = jax.random.PRNGKey(0)
    k_param, k_fmri, k_img, k_fwd = jax.random.split(root, 4)

    params = init_params(k_param, cfg)
    sample = {
        "fmri": jax.random.normal(k_fmri, (cfg.batch, cfg.fmri_dim), jnp.float32),
        "image": jax.random.uniform(k_img, (cfg.batch, cfg.C, cfg.H, cfg.W),
                                    jnp.float32),
    }

    outs = vae_gan_cognitive_forward(params, sample, k_fwd, cfg)
    outs = jax.block_until_ready(outs)

    gt_x, x_tilde, disc_class, disc_layer, mus, log_variances = outs
    assert gt_x.shape == (cfg.batch, cfg.C, cfg.H, cfg.W)
    assert x_tilde.shape == (cfg.batch, cfg.C, cfg.H, cfg.W)
    assert disc_class.shape == (3 * cfg.batch, 1)
    assert disc_layer.shape == (2 * cfg.batch, cfg.disc_feat)
    assert mus.shape == (cfg.batch, cfg.z_size)
    assert log_variances.shape == (cfg.batch, cfg.z_size)
    assert all(bool(jnp.all(jnp.isfinite(o))) for o in outs)
    assert bool(jnp.all((disc_class >= 0.0) & (disc_class <= 1.0)))
    assert bool(jnp.all((x_tilde >= 0.0) & (x_tilde <= 1.0)))

    print("KERNEL_OK")
</pallas_src>

<mosaic_0001>
module attributes {stable_mosaic.version = 11 : i64} {
  func.func @_fused_forward_kernel(%arg0: memref<8x64xf32, #tpu.memory_space<vmem>>, %arg1: memref<8x1024xf32, #tpu.memory_space<vmem>>, %arg2: memref<8x32xf32, #tpu.memory_space<vmem>>, %arg3: memref<8x32xf32, #tpu.memory_space<vmem>>, %arg4: memref<64x32xbf16, #tpu.memory_space<vmem>>, %arg5: memref<1x32xf32, #tpu.memory_space<vmem>>, %arg6: memref<32x64xbf16, #tpu.memory_space<vmem>>, %arg7: memref<1x64xf32, #tpu.memory_space<vmem>>, %arg8: memref<32x1024xbf16, #tpu.memory_space<vmem>>, %arg9: memref<1x1024xf32, #tpu.memory_space<vmem>>, %arg10: memref<1024x64xbf16, #tpu.memory_space<vmem>>, %arg11: memref<1x64xf32, #tpu.memory_space<vmem>>, %arg12: memref<1x64xf32, #tpu.memory_space<vmem>>, %arg13: memref<1x1xf32, #tpu.memory_space<vmem>>, %arg14: memref<8x64xf32, #tpu.memory_space<vmem>>, %arg15: memref<8x1024xf32, #tpu.memory_space<vmem>>, %arg16: memref<16x64xf32, #tpu.memory_space<vmem>>, %arg17: memref<24x1xf32, #tpu.memory_space<vmem>>) attributes {dimension_semantics = [], scalar_prefetch = 0 : i64, scratch_operands = 0 : i64, tpu.core_type = #tpu.core_type<tc>} {
    %c0 = arith.constant 0 : index
    %c0_0 = arith.constant 0 : index
    %0 = vector.load %arg0[%c0, %c0_0] : memref<8x64xf32, #tpu.memory_space<vmem>>, vector<8x64xf32>
    %1 = arith.truncf %0 : vector<8x64xf32> to vector<8x64xbf16>
    %c0_1 = arith.constant 0 : index
    %c0_2 = arith.constant 0 : index
    %2 = vector.load %arg4[%c0_1, %c0_2] : memref<64x32xbf16, #tpu.memory_space<vmem>>, vector<64x32xbf16>
    %cst = arith.constant dense<0.000000e+00> : vector<8x32xf32>
    %3 = tpu.matmul %1, %2, %cst {dimension_numbers = #tpu.dot_dimension_numbers<[1], [0], [0], [1], [0, 0, 1, 1], [], []>} : vector<8x64xbf16>, vector<64x32xbf16>, vector<8x32xf32> -> vector<8x32xf32>
    %c0_3 = arith.constant 0 : index
    %c0_4 = arith.constant 0 : index
    %4 = vector.load %arg5[%c0_3, %c0_4] : memref<1x32xf32, #tpu.memory_space<vmem>>, vector<1x32xf32>
    %5 = vector.broadcast %4 : vector<1x32xf32> to vector<8x32xf32>
    %6 = arith.addf %3, %5 : vector<8x32xf32>
    %cst_5 = arith.constant 0.000000e+00 : f32
    %7 = vector.broadcast %cst_5 : f32 to vector<8x32xf32>
    %8 = arith.maximumf %6, %7 : vector<8x32xf32>
    %9 = arith.truncf %8 : vector<8x32xf32> to vector<8x32xbf16>
    %c0_6 = arith.constant 0 : index
    %c0_7 = arith.constant 0 : index
    %10 = vector.load %arg6[%c0_6, %c0_7] : memref<32x64xbf16, #tpu.memory_space<vmem>>, vector<32x64xbf16>
    %cst_8 = arith.constant dense<0.000000e+00> : vector<8x64xf32>
    %11 = tpu.matmul %9, %10, %cst_8 {dimension_numbers = #tpu.dot_dimension_numbers<[1], [0], [0], [1], [0, 0, 1, 1], [], []>} : vector<8x32xbf16>, vector<32x64xbf16>, vector<8x64xf32> -> vector<8x64xf32>
    %c0_9 = arith.constant 0 : index
    %c0_10 = arith.constant 0 : index
    %12 = vector.load %arg7[%c0_9, %c0_10] : memref<1x64xf32, #tpu.memory_space<vmem>>, vector<1x64xf32>
    %13 = vector.broadcast %12 : vector<1x64xf32> to vector<8x64xf32>
    %14 = arith.addf %11, %13 : vector<8x64xf32>
    %c0_11 = arith.constant 0 : index
    %c0_12 = arith.constant 0 : index
    %15 = vector.load %arg14[%c0_11, %c0_12] : memref<8x64xf32, #tpu.memory_space<vmem>>, vector<8x64xf32>
    tpu.vector_store %arg14[%c0_11, %c0_12], %14 {strides = array<i32>} : memref<8x64xf32, #tpu.memory_space<vmem>>, vector<8x64xf32>,
    %16 = vector.extract_strided_slice %14 {offsets = [0, 0], sizes = [8, 32], strides = [1, 1]} : vector<8x64xf32> to vector<8x32xf32>
    %17 = vector.extract_strided_slice %14 {offsets = [0, 32], sizes = [8, 32], strides = [1, 1]} : vector<8x64xf32> to vector<8x32xf32>
    %c0_13 = arith.constant 0 : index
    %c0_14 = arith.constant 0 : index
    %18 = vector.load %arg2[%c0_13, %c0_14] : memref<8x32xf32, #tpu.memory_space<vmem>>, vector<8x32xf32>
    %cst_15 = arith.constant 5.000000e-01 : f32
    %19 = vector.broadcast %cst_15 : f32 to vector<8x32xf32>
    %20 = arith.mulf %19, %17 : vector<8x32xf32>
    %21 = math.exp %20 : vector<8x32xf32>
    %22 = arith.mulf %18, %21 : vector<8x32xf32>
    %23 = arith.addf %22, %16 : vector<8x32xf32>
    %c0_16 = arith.constant 0 : index
    %c0_17 = arith.constant 0 : index
    %24 = vector.load %arg3[%c0_16, %c0_17] : memref<8x32xf32, #tpu.memory_space<vmem>>, vector<8x32xf32>
    %25 = tpu.concatenate %23, %24 in 0 : vector<8x32xf32>, vector<8x32xf32> -> vector<16x32xf32>
    %26 = arith.truncf %25 : vector<16x32xf32> to vector<16x32xbf16>
    %c0_18 = arith.constant 0 : index
    %c0_19 = arith.constant 0 : index
    %27 = vector.load %arg8[%c0_18, %c0_19] : memref<32x1024xbf16, #tpu.memory_space<vmem>>, vector<32x1024xbf16>
    %cst_20 = arith.constant dense<0.000000e+00> : vector<16x1024xf32>
    %28 = tpu.matmul %26, %27, %cst_20 {dimension_numbers = #tpu.dot_dimension_numbers<[1], [0], [0], [1], [0, 0, 1, 1], [], []>} : vector<16x32xbf16>, vector<32x1024xbf16>, vector<16x1024xf32> -> vector<16x1024xf32>
    %c0_21 = arith.constant 0 : index
    %c0_22 = arith.constant 0 : index
    %29 = vector.load %arg9[%c0_21, %c0_22] : memref<1x1024xf32, #tpu.memory_space<vmem>>, vector<1x1024xf32>
    %30 = vector.broadcast %29 : vector<1x1024xf32> to vector<16x1024xf32>
    %31 = arith.addf %28, %30 : vector<16x1024xf32>
    %32 = arith.negf %31 : vector<16x1024xf32>
    %33 = math.exp %32 : vector<16x1024xf32>
    %cst_23 = arith.constant 1.000000e+00 : f32
    %34 = vector.broadcast %cst_23 : f32 to vector<16x1024xf32>
    %35 = arith.addf %34, %33 : vector<16x1024xf32>
    %36 = arith.divf %34, %35 : vector<16x1024xf32>
    %37 = vector.extract_strided_slice %36 {offsets = [0, 0], sizes = [8, 1024], strides = [1, 1]} : vector<16x1024xf32> to vector<8x1024xf32>
    %38 = vector.extract_strided_slice %36 {offsets = [8, 0], sizes = [8, 1024], strides = [1, 1]} : vector<16x1024xf32> to vector<8x1024xf32>
    %c0_24 = arith.constant 0 : index
    %c0_25 = arith.constant 0 : index
    %39 = vector.load %arg15[%c0_24, %c0_25] : memref<8x1024xf32, #tpu.memory_space<vmem>>, vector<8x1024xf32>
    tpu.vector_store %arg15[%c0_24, %c0_25], %37 {strides = array<i32>} : memref<8x1024xf32, #tpu.memory_space<vmem>>, vector<8x1024xf32>,
    %c0_26 = arith.constant 0 : index
    %c0_27 = arith.constant 0 : index
    %40 = vector.load %arg1[%c0_26, %c0_27] : memref<8x1024xf32, #tpu.memory_space<vmem>>, vector<8x1024xf32>
    %41 = tpu.concatenate %40, %37, %38 in 0 : vector<8x1024xf32>, vector<8x1024xf32>, vector<8x1024xf32> -> vector<24x1024xf32>
    %42 = arith.truncf %41 : vector<24x1024xf32> to vector<24x1024xbf16>
    %c0_28 = arith.constant 0 : index
    %c0_29 = arith.constant 0 : index
    %43 = vector.load %arg10[%c0_28, %c0_29] : memref<1024x64xbf16, #tpu.memory_space<vmem>>, vector<1024x64xbf16>
    %cst_30 = arith.constant dense<0.000000e+00> : vector<24x64xf32>
    %44 = tpu.matmul %42, %43, %cst_30 {dimension_numbers = #tpu.dot_dimension_numbers<[1], [0], [0], [1], [0, 0, 1, 1], [], []>} : vector<24x1024xbf16>, vector<1024x64xbf16>, vector<24x64xf32> -> vector<24x64xf32>
    %c0_31 = arith.constant 0 : index
    %c0_32 = arith.constant 0 : index
    %45 = vector.load %arg11[%c0_31, %c0_32] : memref<1x64xf32, #tpu.memory_space<vmem>>, vector<1x64xf32>
    %46 = vector.broadcast %45 : vector<1x64xf32> to vector<24x64xf32>
    %47 = arith.addf %44, %46 : vector<24x64xf32>
    %cst_33 = arith.constant 0.000000e+00 : f32
    %48 = vector.broadcast %cst_33 : f32 to vector<24x64xf32>
    %49 = arith.maximumf %47, %48 : vector<24x64xf32>
    %50 = vector.extract_strided_slice %49 {offsets = [0, 0], sizes = [16, 64], strides = [1, 1]} : vector<24x64xf32> to vector<16x64xf32>
    %c0_34 = arith.constant 0 : index
    %c0_35 = arith.constant 0 : index
    %51 = vector.load %arg16[%c0_34, %c0_35] : memref<16x64xf32, #tpu.memory_space<vmem>>, vector<16x64xf32>
    tpu.vector_store %arg16[%c0_34, %c0_35], %50 {strides = array<i32>} : memref<16x64xf32, #tpu.memory_space<vmem>>, vector<16x64xf32>,
    %c0_36 = arith.constant 0 : index
    %c0_37 = arith.constant 0 : index
    %52 = vector.load %arg12[%c0_36, %c0_37] : memref<1x64xf32, #tpu.memory_space<vmem>>, vector<1x64xf32>
    %53 = vector.broadcast %52 : vector<1x64xf32> to vector<24x64xf32>
    %54 = arith.mulf %49, %53 : vector<24x64xf32>
    %cst_38 = arith.constant dense<0.000000e+00> : vector<24xf32>
    %55 = vector.multi_reduction <add>, %54, %cst_38 [1] : vector<24x64xf32> to vector<24xf32>
    %56 = vector.shape_cast %55 : vector<24xf32> to vector<24x1xf32>
    %c0_39 = arith.constant 0 : index
    %c0_40 = arith.constant 0 : index
    %57 = vector.load %arg13[%c0_39, %c0_40] : memref<1x1xf32, #tpu.memory_space<vmem>>, vector<1x1xf32>
    %58 = vector.broadcast %57 : vector<1x1xf32> to vector<24x1xf32>
    %59 = arith.addf %56, %58 : vector<24x1xf32>
    %60 = arith.negf %59 : vector<24x1xf32>
    %61 = math.exp %60 : vector<24x1xf32>
    %cst_41 = arith.constant 1.000000e+00 : f32
    %62 = vector.broadcast %cst_41 : f32 to vector<24x1xf32>
    %63 = arith.addf %62, %61 : vector<24x1xf32>
    %64 = arith.divf %62, %63 : vector<24x1xf32>
    %c0_42 = arith.constant 0 : index
    %c0_43 = arith.constant 0 : index
    %65 = vector.load %arg17[%c0_42, %c0_43] : memref<24x1xf32, #tpu.memory_space<vmem>>, vector<24x1xf32>
    tpu.vector_store %arg17[%c0_42, %c0_43], %64 {strides = array<i32>} : memref<24x1xf32, #tpu.memory_space<vmem>>, vector<24x1xf32>,
    return
  }
}

</mosaic_0001>

<bundles_post_ra>
// kernel: tpu_custom_call.1
= control target key start
LH: loop header
LB: loop body
LE: loop exit
PB: predicated region body
PF: predicated region fallthrough
CT: control target
= control target key end

     0   :  { %s2456_s0 = inlined_call_operand.vmem [shape: f32[8,64], index: 0, kind: input, shape index: {}]   ;;  %s2457_s1 = inlined_call_operand.vmem [shape: f32[8,1024], index: 1, kind: input, shape index: {}]   ;;  %s2458_s2 = inlined_call_operand.vmem [shape: f32[8,32], index: 2, kind: input, shape index: {}]   ;;  %s2459_s3 = inlined_call_operand.vmem [shape: f32[8,32], index: 3, kind: input, shape index: {}]   ;;  %s2460_s4 = inlined_call_operand.vmem [shape: bf16[64,32], index: 4, kind: input, shape index: {}]   ;;  %s2461_s5 = inlined_call_operand.vmem [shape: f32[1,32], index: 5, kind: input, shape index: {}]   ;;  %s2462_s6 = inlined_call_operand.vmem [shape: bf16[32,64], index: 6, kind: input, shape index: {}]   ;;  %s2463_s7 = inlined_call_operand.vmem [shape: f32[1,64], index: 7, kind: input, shape index: {}]   ;;  %s2464_s8 = inlined_call_operand.vmem [shape: bf16[32,1024], index: 8, kind: input, shape index: {}]   ;;  %s2465_s9 = inlined_call_operand.vmem [shape: f32[1,1024], index: 9, kind: input, shape index: {}]   ;;  %s2466_s10 = inlined_call_operand.vmem [shape: bf16[1024,64], index: 10, kind: input, shape index: {}]   ;;  %s2467_s11 = inlined_call_operand.vmem [shape: f32[1,64], index: 11, kind: input, shape index: {}]   ;;  %s2468_s12 = inlined_call_operand.vmem [shape: f32[1,64], index: 12, kind: input, shape index: {}]   ;;  %s2469_s13 = inlined_call_operand.<no memory space> [shape: f32[1,1], index: 13, kind: input, shape index: {}]   ;;  %s2470_s14 = inlined_call_operand.hbm [shape: f32[8,64], index: 14, kind: output, shape index: {0}]   ;;  %s2471_s15 = inlined_call_operand.hbm [shape: f32[8,1024], index: 15, kind: output, shape index: {1}]   ;;  %s2472_s16 = inlined_call_operand.hbm [shape: f32[16,64], index: 16, kind: output, shape index: {2}]   ;;  %s2473_s17 = inlined_call_operand.vmem [shape: f32[24,1], index: 17, kind: output, shape index: {3}]  }
   0x1   :  { %2475 = sst [smem:[#allocation10_spill]] %s2456_s0  ;;  %v23_v0 = vstv %s2469_s13 }
   0x2   :  { %2476 = sst [smem:[#allocation11_spill]] %s2457_s1  ;;  %24 = vst [vmem:[#allocation2] sm:$0x1] %v23_v0 }
   0x3   :  { %25 = vsyncpa [#allocation4], 0  ;;  %v1743_v1 = vld [vmem:[%s2460_s4] sm:$0xff]   ;;  %v1961_v2 = vmov 0.0   ;;  %v1744_v3 = vld [vmem:[%s2460_s4 + $0x8] sm:$0xff]   ;;  %vm1962_vm0 = vmmov 0  }
   0x4   :  { %1714 = vmatprep.subr.bf16.mxu0 %v1961_v2  ;;  %1726 = vmatprep.subr.bf16.mxu1 %v1961_v2  ;;  %v1745_v4 = vld [vmem:[%s2460_s4 + $0x10] sm:$0xff]   ;;  %vm97_vm1 = vcmask 523264   ;;  %v1746_v5 = vld [vmem:[%s2460_s4 + $0x18] sm:$0xff]   ;;  %s2477_s20 = sld [smem:[#allocation10_spill]] }
   0x5   :  { %1715 = vmatpush3.bf16.msra.mxu0 %v1743_v1  ;;  %1722 = vmatprep.mubr.msk.bf16.mxu0 %vm1962_vm0, %v1961_v2 }
   0x6   :  { %1716 = vmatprep.subr.bf16.mxu0 %v1961_v2  ;;  %1730 = vmatprep.mubr.msk.bf16.mxu1 %vm1962_vm0, %v1961_v2 }
   0x9   :  { %1717 = vmatpush3.bf16.msra.mxu0 %v1744_v3 }
   0xa   :  { %1718 = vmatprep.subr.bf16.mxu0 %v1961_v2  ;;  %v56_v6 = vld [vmem:[%s2477_s20] sm:$0xff] }
   0xb   :  { %v57_v7 = vpack.c.bf16 %v56_v6, %v56_v6 }
   0xd   :  { %1719 = vmatpush3.bf16.msra.mxu0 %v1745_v4 }
   0xe   :  { %1720 = vmatprep.subr.bf16.mxu0 %v1961_v2 }
  0x11   :  { %1721 = vmatpush3.bf16.msra.mxu0 %v1746_v5 }
  0x14   :  { %1723 = vmatmul.mubr.msk.bf16.vlgmr.msra.gmra.mrb[0].mxu0 %vm97_vm1, %v57_v7 }
  0x15   :  { %26 = vsyncpa [#allocation6], 0  ;;  %v1747_v8 = vld [vmem:[%s2462_s6] sm:$0xff]   ;;  %v1748_v9 = vld [vmem:[%s2462_s6 + $0x8] sm:$0xff]   ;;  %vm166_vm2 = vcmask 261120   ;;  %v1963_v47 = vmov 0  }
  0x16   :  { %1727 = vmatpush3.bf16.msra.mxu1 %v1747_v8  ;;  %v1478_v10 = vld [vmem:[%s2461_s5] ss:$0 sm:$0xff]  ;;  %v224_v20 = vld [vmem:[%s2464_s8 + $0x8] sm:$0xff]  ;;  %v225_v42 = vld [vmem:[%s2464_s8 + $0x10] sm:$0xff]  ;;  %439 = vmatprep.mubr.bf16.mxu0 %v1963_v47  ;;  %s1964_s0 = smov 96   ;;  %s2478_s4 = sld [smem:[#allocation11_spill]] }
  0x17   :  { %1728 = vmatprep.subr.bf16.mxu1 %v1961_v2  ;;  %v223_v18 = vld [vmem:[%s2464_s8] sm:$0xff]  ;;  %v228_v23 = vld [vmem:[%s2464_s8 + $0x28] sm:$0xff]  ;;  %v229_v43 = vld [vmem:[%s2464_s8 + $0x30] sm:$0xff] }
  0x18   :  { %v227_v19 = vld [vmem:[%s2464_s8 + $0x20] sm:$0xff]  ;;  %v1490_v24 = vcombine.low %v224_v20, %v228_v23  ;;  %v1491_v25 = vcombine.high %v224_v20, %v228_v23  ;;  %v232_v35 = vld [vmem:[%s2464_s8 + $0x48] sm:$0xff]  ;;  %v226_v44 = vld [vmem:[%s2464_s8 + $0x18] sm:$0xff]  ;;  %v1493_v45 = vcombine.high %v225_v42, %v229_v43  ;;  %v1492_v48 = vcombine.low %v225_v42, %v229_v43 }
  0x19   :  { %v1488_v21 = vcombine.low %v223_v18, %v227_v19  ;;  %v1489_v22 = vcombine.high %v223_v18, %v227_v19  ;;  %v1484_v26 = vld [vmem:[%s2463_s7] ss:$0 sm:$0xff]  ;;  %v236_v38 = vld [vmem:[%s2464_s8 + $0x68] sm:$0xff]  ;;  %v230_v46 = vld [vmem:[%s2464_s8 + $0x38] sm:$0xff] }
  0x1a   :  { %1729 = vmatpush3.bf16.msra.mxu1 %v1748_v9  ;;  %407 = vmatprep.subr.bf16.mxu0 %v1491_v25  ;;  %v231_v33 = vld [vmem:[%s2464_s8 + $0x40] sm:$0xff]  ;;  %v1498_v40 = vcombine.low %v232_v35, %v236_v38  ;;  %v1499_v41 = vcombine.high %v232_v35, %v236_v38  ;;  %v1494_v49 = vcombine.low %v226_v44, %v230_v46  ;;  %v233_v56 = vld [vmem:[%s2464_s8 + $0x50] sm:$0xff]  ;;  %v234_v58 = vld [vmem:[%s2464_s8 + $0x58] sm:$0xff] }
  0x1b   :  { %364 = vmatprep.subr.bf16.mxu1 %v1489_v22  ;;  %408 = vmatpush1.bf16.msra.mxu0 %v1490_v24  ;;  %v235_v34 = vld [vmem:[%s2464_s8 + $0x60] sm:$0xff]  ;;  %v1495_v50 = vcombine.high %v226_v44, %v230_v46  ;;  %v237_v57 = vld [vmem:[%s2464_s8 + $0x70] sm:$0xff]  ;;  %v238_v59 = vld [vmem:[%s2464_s8 + $0x78] sm:$0xff] }
  0x1c   :  { %v1497_v37 = vcombine.high %v231_v33, %v235_v34  ;;  %v1496_v39 = vcombine.low %v231_v33, %v235_v34  ;;  %409 = vmatprep.subr.bf16.mxu0 %v1499_v41  ;;  %v211_v52 = vld [vmem:[%s2458_s2] sm:$0xff]  ;;  %v1501_v62 = vcombine.high %v233_v56, %v237_v57  ;;  %v1503_v63 = vcombine.high %v234_v58, %v238_v59  ;;  %v1753_v6 = vld [vmem:[%s2466_s10 + $0x48] sm:$0xff]   ;;  %v1780_v33 = vld [vmem:[%s2466_s10 + $0xb8] sm:$0xff]  }
  0x1d   :  { %v221_v54 = vld [vmem:[%s2459_s3] sm:$0xff]  ;;  %v1500_v0 = vcombine.low %v233_v56, %v237_v57  ;;  %v1502_v1 = vcombine.low %v234_v58, %v238_v59  ;;  %v1754_v7 = vld [vmem:[%s2466_s10 + $0xc8] sm:$0xff]  }
  0x1e   :  { %v1749_v2 = vld [vmem:[%s2466_s10 + $0x40] sm:$0xff]   ;;  %v1755_v8 = vld [vmem:[%s2466_s10 + $0x8] sm:$0xff]  }
  0x1f   :  { %410 = vmatpush1.bf16.msra.mxu0 %v1498_v40  ;;  %v1750_v3 = vld [vmem:[%s2466_s10 + $0xc0] sm:$0xff]   ;;  %v1756_v9 = vld [vmem:[%s2466_s10 + $0x88] sm:$0xff]  }
  0x20   :  { %493 = vmatprep.subr.bf16.mxu0 %v1495_v50  ;;  %v1751_v4 = vld [vmem:[%s2466_s10] sm:$0xff]   ;;  %v1769_v22 = vld [vmem:[%s2466_s10 + $0x68] sm:$0xff]  }
  0x21   :  { %v1752_v5 = vld [vmem:[%s2466_s10 + $0x80] sm:$0xff]   ;;  %v1770_v23 = vld [vmem:[%s2466_s10 + $0xe8] sm:$0xff]  }
  0x22   :  { %v1765_v18 = vld [vmem:[%s2466_s10 + $0x60] sm:$0xff]   ;;  %v1771_v24 = vld [vmem:[%s2466_s10 + $0x28] sm:$0xff]  }
  0x23   :  { %v1766_v19 = vld [vmem:[%s2466_s10 + $0xe0] sm:$0xff]   ;;  %v1772_v25 = vld [vmem:[%s2466_s10 + $0xa8] sm:$0xff]  }
  0x24   :  { %v1767_v20 = vld [vmem:[%s2466_s10 + $0x20] sm:$0xff]  }
  0x25   :  { %v1781_v34 = vld [vmem:[%s2466_s10 + $0x140] sm:$0xff]  }
  0x26   :  { %v1782_v35 = vld [vmem:[%s2466_s10 + $0x1c0] sm:$0xff]  }
  0x27   :  { %v239_v40 = vld [vmem:[%s2465_s9] sm:$0xff] }
  0xe7   :  { %v135_v11 = vpop.f32.mrb[0].mxu0 }
  0xe8   :  { %v136_v12 = vadd.f32 %v1478_v10, %v135_v11  ;;  %v1724_v13 = vpop.f32.mrb[1].mxu0  ;;  %v1757_v10 = vld [vmem:[%s2466_s10 + $0x50] sm:$0xff]  }
  0xe9   :  { %v138_v14 = vpop.f32.mrb[2].mxu0  ;;  %v1758_v11 = vld [vmem:[%s2466_s10 + $0xd0] sm:$0xff]  }
  0xea   :  { %v141_v15 = vmax.f32 %v136_v12, 0.0  ;;  %v1725_v16 = vpop.f32.mrb[3].mxu0  ;;  %v1759_v12 = vld [vmem:[%s2466_s10 + $0x10] sm:$0xff]   ;;  %v1761_v14 = vld [vmem:[%s2466_s10 + $0x58] sm:$0xff]  }
  0xeb   :  { %v1760_v13 = vld [vmem:[%s2466_s10 + $0x90] sm:$0xff]   ;;  %v1763_v16 = vld [vmem:[%s2466_s10 + $0x18] sm:$0xff]  }
  0xec   :  { %v142_v17 = vpack.c.bf16 %v141_v15, %v141_v15  ;;  %v1762_v15 = vld [vmem:[%s2466_s10 + $0xd8] sm:$0xff]  }
  0xee   :  { %1731 = vmatmul.mubr.msk.bf16.vlgmr.msra.gmra.mrb[0].mxu1 %vm166_vm2, %v142_v17  ;;  %v1764_v17 = vld [vmem:[%s2466_s10 + $0x98] sm:$0xff]  }
  0xef   :  { %365 = vmatpush1.bf16.msra.mxu1 %v1488_v21  ;;  %396 = vmatprep.mubr.bf16.mxu1 %v1963_v47  ;;  %v1768_v21 = vld [vmem:[%s2466_s10 + $0xa0] sm:$0xff]  }
  0xf0   :  { %366 = vmatprep.subr.bf16.mxu1 %v1497_v37 }
  0xf3   :  { %367 = vmatpush1.bf16.msra.mxu1 %v1496_v39 }
  0xf4   :  { %450 = vmatprep.subr.bf16.mxu1 %v1493_v45 }
 0x1c1   :  { %v204_v27 = vpop.f32.mrb[0].mxu1 }
 0x1c2   :  { %v205_v28 = vadd.f32 %v1484_v26, %v204_v27  ;;  %v1732_v29 = vpop.f32.mrb[1].mxu1  ;;  %v1773_v26 = vld [vmem:[%s2466_s10 + $0x70] sm:$0xff]  }
 0x1c3   :  { %v207_v30 = vpop.f32.mrb[2].mxu1  ;;  %v1774_v27 = vld [vmem:[%s2466_s10 + $0xf0] sm:$0xff]  }
 0x1c4   :  { %v212_v31 = vmul.f32 0.5, %v205_v28  ;;  %210 = vst.msk [vmem:[#allocation3] sm:$0xff] %vm97_vm1, %v205_v28  ;;  %v1733_v32 = vpop.f32.mrb[3].mxu1  ;;  %v1776_v29 = vld [vmem:[%s2466_s10 + $0xb0] sm:$0xff]   ;;  %v1777_v30 = vld [vmem:[%s2466_s10 + $0x78] sm:$0xff]  }
 0x1c5   :  { %v1779_v32 = vld [vmem:[%s2466_s10 + $0x38] sm:$0xff]  }
 0x1c6   :  { %v213_v36 = vmul.f32 1.442695, %v212_v31  ;;  %v1778_v31 = vld [vmem:[%s2466_s10 + $0xf8] sm:$0xff]  }
 0x1c8   :  { %1813 = vpow2.f32 %v213_v36  ;;  %v241_v36 = vlaneseq }
 0x1ca   :  { %v242_v37 = vshrl.u32 %v241_v36, 7 }
 0x1cc   :  { %v243_v38 = vsub.s32 0, %v242_v37  ;;  %v251_v39 = vsub.s32 2, %v242_v37  ;;  %v247_v41 = vsub.s32 1, %v242_v37  ;;  %v255_v42 = vsub.s32 3, %v242_v37 }
 0x1cd   :  { %v263_v59 = vsub.s32 5, %v242_v37 }
 0x1ce   :  { %v244_v43 = vrot.slane %v239_v40, %v243_v38  ;;  %v252_v44 = vrot.slane %v239_v40, %v251_v39  ;;  %v248_v45 = vrot.slane %v239_v40, %v247_v41  ;;  %v256_v46 = vrot.slane %v239_v40, %v255_v42 }
 0x1d2   :  { %v1814_v51 = vpop.eup %1813 }
 0x1d3   :  { %216 = vrot.lane.b32.xlu0 %v1814_v51, %s1964_s0  ;;  %s1966_s0 = smov [#allocation3]  }
 0x1d4   :  { %s1437_s13 = sshll.u32 %s1966_s0, 4  ;;  %s1438_s13 = int_to_ptr.vmem [resolvable:$true] %s1437_s13 }
 0x245   :  { %v217_v53 = vpop.permute.xlu0 %216 }
 0x246   :  { %v219_v55 = vmul.f32 %v217_v53, %v211_v52  ;;  %v259_v53 = vsub.s32 4, %v242_v37 }
 0x248   :  { %v220_v60 = vadd.f32 %v219_v55, %v205_v28  ;;  %v1775_v28 = vld [vmem:[%s2466_s10 + $0x30] sm:$0xff]  }
 0x24a   :  { %v222_v61 = vpack.c.bf16 %v221_v54, %v220_v60  ;;  %v267_v54 = vsub.s32 6, %v242_v37  ;;  %v271_v60 = vsub.s32 7, %v242_v37 }
 0x24c   :  { %1504 = vmatmul.mubr.msk.bf16.vlgmr.msra.gmra.mrb[4].mxu1 %vm166_vm2, %v222_v61  ;;  %1505 = vmatmul.mubr.msk.bf16.vlgmr.msra.gmra.mrb[4].mxu0 %vm166_vm2, %v222_v61 }
 0x24d   :  { %451 = vmatpush1.bf16.msra.mxu1 %v1492_v48  ;;  %494 = vmatpush1.bf16.msra.mxu0 %v1494_v49 }
 0x24e   :  { %452 = vmatprep.subr.bf16.mxu1 %v1501_v62  ;;  %495 = vmatprep.subr.bf16.mxu0 %v1503_v63 }
 0x24f   :  { %482 = vmatprep.mubr.bf16.mxu1 %v1963_v47  ;;  %525 = vmatprep.mubr.bf16.mxu0 %v1963_v47 }
 0x251   :  { %453 = vmatpush1.bf16.msra.mxu1 %v1500_v0  ;;  %496 = vmatpush1.bf16.msra.mxu0 %v1502_v1 }
 0x252   :  { %1602 = vmatprep.subr.bf16.mxu1 %v1749_v2  ;;  %1630 = vmatprep.subr.bf16.mxu0 %v1750_v3 }
 0x254   :  { %1506 = vmatmul.mubr.msk.bf16.vlgmr.msra.gmra.mrb[8].mxu1 %vm166_vm2, %v222_v61  ;;  %1507 = vmatmul.mubr.msk.bf16.vlgmr.msra.gmra.mrb[8].mxu0 %vm166_vm2, %v222_v61 }
 0x255   :  { %1603 = vmatpush3.bf16.msra.mxu1 %v1751_v4  ;;  %1631 = vmatpush3.bf16.msra.mxu0 %v1752_v5 }
 0x256   :  { %1604 = vmatprep.subr.bf16.mxu1 %v1753_v6  ;;  %1632 = vmatprep.subr.bf16.mxu0 %v1754_v7 }
 0x259   :  { %1605 = vmatpush3.bf16.msra.mxu1 %v1755_v8  ;;  %1633 = vmatpush3.bf16.msra.mxu0 %v1756_v9  ;;  %v2256_v8 = vrot.slane %v239_v40, %v259_v53  ;;  %v2258_v9 = vrot.slane %v239_v40, %v267_v54 }
 0x25a   :  { %1606 = vmatprep.subr.bf16.mxu1 %v1757_v10  ;;  %1634 = vmatprep.subr.bf16.mxu0 %v1758_v11  ;;  %v2260_v11 = vrot.slane %v239_v40, %v263_v59 }
 0x25d   :  { %1607 = vmatpush3.bf16.msra.mxu1 %v1759_v12  ;;  %1635 = vmatpush3.bf16.msra.mxu0 %v1760_v13  ;;  %v2262_v12 = vrot.slane %v239_v40, %v271_v60  ;;  %v643_v60 = vld [vmem:[%s2478_s4 + $0x18] sm:$0xff] }
 0x25e   :  { %1608 = vmatprep.subr.bf16.mxu1 %v1761_v14  ;;  %1636 = vmatprep.subr.bf16.mxu0 %v1762_v15 }
 0x261   :  { %1609 = vmatpush3.bf16.msra.mxu1 %v1763_v16  ;;  %1637 = vmatpush3.bf16.msra.mxu0 %v1764_v17 }
 0x262   :  { %1610 = vmatprep.subr.bf16.mxu1 %v1765_v18  ;;  %1638 = vmatprep.subr.bf16.mxu0 %v1766_v19 }
 0x265   :  { %1611 = vmatpush3.bf16.msra.mxu1 %v1767_v20  ;;  %1639 = vmatpush3.bf16.msra.mxu0 %v1768_v21 }
 0x266   :  { %1612 = vmatprep.subr.bf16.mxu1 %v1769_v22  ;;  %1640 = vmatprep.subr.bf16.mxu0 %v1770_v23 }
 0x269   :  { %1613 = vmatpush3.bf16.msra.mxu1 %v1771_v24  ;;  %1641 = vmatpush3.bf16.msra.mxu0 %v1772_v25 }
 0x26a   :  { %1614 = vmatprep.subr.bf16.mxu1 %v1773_v26  ;;  %1642 = vmatprep.subr.bf16.mxu0 %v1774_v27 }
 0x26d   :  { %1615 = vmatpush3.bf16.msra.mxu1 %v1775_v28  ;;  %1643 = vmatpush3.bf16.msra.mxu0 %v1776_v29 }
 0x26e   :  { %1616 = vmatprep.subr.bf16.mxu1 %v1777_v30  ;;  %1644 = vmatprep.subr.bf16.mxu0 %v1778_v31 }
 0x271   :  { %1617 = vmatpush3.bf16.msra.mxu1 %v1779_v32  ;;  %1645 = vmatpush3.bf16.msra.mxu0 %v1780_v33 }
 0x272   :  { %1658 = vmatprep.subr.bf16.mxu1 %v1781_v34  ;;  %1686 = vmatprep.subr.bf16.mxu0 %v1782_v35 }
 0x31f   :  { %v398_v47 = vpop.f32.mrb[4].mxu1  ;;  %v441_v48 = vpop.f32.mrb[4].mxu0 }
 0x320   :  { %v399_v49 = vadd.f32 %v398_v47, %v244_v43  ;;  %v442_v50 = vadd.f32 %v441_v48, %v252_v44  ;;  %v400_v51 = vpop.f32.mrb[5].mxu1  ;;  %v443_v52 = vpop.f32.mrb[5].mxu0 }
 0x321   :  { %v401_v55 = vadd.f32 %v400_v51, %v248_v45  ;;  %v444_v56 = vadd.f32 %v443_v52, %v256_v46  ;;  %v402_v57 = vpop.f32.mrb[6].mxu1  ;;  %v445_v58 = vpop.f32.mrb[6].mxu0 }
 0x322   :  { %v1508_v61 = vmul.f32 -1.442695, %v399_v49  ;;  %v1510_v62 = vmul.f32 -1.442695, %v442_v50  ;;  %v403_v63 = vadd.f32 %v402_v57, %v244_v43  ;;  %v446_v0 = vadd.f32 %v445_v58, %v252_v44  ;;  %v404_v1 = vpop.f32.mrb[7].mxu1  ;;  %v447_v2 = vpop.f32.mrb[7].mxu0 }
 0x323   :  { %v1509_v3 = vmul.f32 -1.442695, %v401_v55  ;;  %v1511_v4 = vmul.f32 -1.442695, %v444_v56  ;;  %v405_v5 = vadd.f32 %v404_v1, %v248_v45  ;;  %v448_v6 = vadd.f32 %v447_v2, %v256_v46  ;;  %v641_v58 = vld [vmem:[%s2478_s4 + $0x8] sm:$0xff] }
 0x324   :  { %1815 = vpow2.f32 %v1508_v61  ;;  %v1516_v7 = vmul.f32 -1.442695, %v403_v63  ;;  %v1518_v10 = vmul.f32 -1.442695, %v446_v0  ;;  %v640_v61 = vld [vmem:[%s2478_s4] sm:$0xff]  ;;  %v642_v63 = vld [vmem:[%s2478_s4 + $0x10] sm:$0xff] }
 0x325   :  { %1817 = vpow2.f32 %v1510_v62  ;;  %v1517_v13 = vmul.f32 -1.442695, %v405_v5  ;;  %v1519_v14 = vmul.f32 -1.442695, %v448_v6 }
 0x326   :  { %1819 = vpow2.f32 %v1509_v3  ;;  %v1783_v3 = vld [vmem:[%s2466_s10 + $0x100] sm:$0xff]  }
 0x327   :  { %1821 = vpow2.f32 %v1511_v4  ;;  %v484_v15 = vpop.f32.mrb[8].mxu1  ;;  %v527_v16 = vpop.f32.mrb[8].mxu0 }
 0x328   :  { %1823 = vpow2.f32 %v1516_v7  ;;  %v485_v17 = vadd.f32 %v484_v15, %v2256_v8  ;;  %v528_v18 = vadd.f32 %v527_v16, %v2258_v9  ;;  %v486_v19 = vpop.f32.mrb[9].mxu1  ;;  %v529_v20 = vpop.f32.mrb[9].mxu0 }
 0x329   :  { %1825 = vpow2.f32 %v1518_v10  ;;  %v487_v21 = vadd.f32 %v486_v19, %v2260_v11  ;;  %v530_v22 = vadd.f32 %v529_v20, %v2262_v12  ;;  %v2268_v23 = vpop.f32.mrb[10].mxu1  ;;  %v2270_v24 = vpop.f32.mrb[10].mxu0  ;;  %v1784_v10 = vld [vmem:[%s2466_s10 + $0x180] sm:$0xff]   ;;  %v1787_v20 = vld [vmem:[%s2466_s10 + $0x108] sm:$0xff]  }
 0x32a   :  { %1827 = vpow2.f32 %v1517_v13  ;;  %v1512_v25 = vmul.f32 -1.442695, %v485_v17  ;;  %v1514_v26 = vmul.f32 -1.442695, %v528_v18  ;;  %v490_v27 = vpop.f32.mrb[11].mxu1  ;;  %v533_v28 = vpop.f32.mrb[11].mxu0  ;;  %v489_v16 = vadd.f32 %v2268_v23, %v2256_v8 }
 0x32b   :  { %1829 = vpow2.f32 %v1519_v14  ;;  %v1513_v29 = vmul.f32 -1.442695, %v487_v21  ;;  %v1515_v30 = vmul.f32 -1.442695, %v530_v22  ;;  %v491_v55 = vadd.f32 %v490_v27, %v2260_v11  ;;  %v1785_v11 = vld [vmem:[%s2466_s10 + $0x148] sm:$0xff]  }
 0x32c   :  { %1831 = vpow2.f32 %v1512_v25  ;;  %v534_v57 = vadd.f32 %v533_v28, %v2262_v12  ;;  %v1786_v14 = vld [vmem:[%s2466_s10 + $0x1c8] sm:$0xff]   ;;  %v532_v18 = vadd.f32 %v2270_v24, %v2258_v9  ;;  %v1789_v9 = vld [vmem:[%s2466_s10 + $0x150] sm:$0xff]  }
 0x32d   :  { %1833 = vpow2.f32 %v1514_v26  ;;  %v1521_v1 = vmul.f32 -1.442695, %v491_v55  ;;  %v1788_v8 = vld [vmem:[%s2466_s10 + $0x188] sm:$0xff]   ;;  %v1790_v24 = vld [vmem:[%s2466_s10 + $0x1d0] sm:$0xff]   ;;  %v1520_v26 = vmul.f32 -1.442695, %v489_v16 }
 0x32e   :  { %v1816_v31 = vpop.eup %1815  ;;  %1835 = vpow2.f32 %v1513_v29  ;;  %v1523_v5 = vmul.f32 -1.442695, %v534_v57  ;;  %v1522_v28 = vmul.f32 -1.442695, %v532_v18  ;;  %v1791_v29 = vld [vmem:[%s2466_s10 + $0x110] sm:$0xff]  }
 0x32f   :  { %v1818_v32 = vpop.eup %1817  ;;  %v584_v33 = vadd.f32 1.0, %v1816_v31  ;;  %1837 = vpow2.f32 %v1515_v30  ;;  %v645_v30 = vld [vmem:[%s2478_s4 + $0x28] sm:$0xff] }
 0x330   :  { %v1820_v34 = vpop.eup %1819  ;;  %v586_v35 = vadd.f32 1.0, %v1818_v32  ;;  %v1792_v32 = vld [vmem:[%s2466_s10 + $0x190] sm:$0xff]  }
 0x331   :  { %v1822_v36 = vpop.eup %1821  ;;  %1839 = vrcp.f32 %v584_v33  ;;  %v585_v37 = vadd.f32 1.0, %v1820_v34  ;;  %v647_v33 = vld [vmem:[%s2478_s4 + $0x38] sm:$0xff] }
 0x332   :  { %v1824_v38 = vpop.eup %1823  ;;  %1841 = vrcp.f32 %v586_v35  ;;  %v587_v39 = vadd.f32 1.0, %v1822_v36  ;;  %v1793_v35 = vld [vmem:[%s2466_s10 + $0x158] sm:$0xff]  }
 0x333   :  { %v1826_v40 = vpop.eup %1825  ;;  %1843 = vrcp.f32 %v585_v37  ;;  %v592_v41 = vadd.f32 1.0, %v1824_v38  ;;  %v1794_v37 = vld [vmem:[%s2466_s10 + $0x1d8] sm:$0xff]  }
 0x334   :  { %v1828_v42 = vpop.eup %1827  ;;  %1845 = vrcp.f32 %v587_v39  ;;  %v594_v43 = vadd.f32 1.0, %v1826_v40  ;;  %v1795_v39 = vld [vmem:[%s2466_s10 + $0x118] sm:$0xff]  }
 0x335   :  { %v1830_v44 = vpop.eup %1829  ;;  %1847 = vrcp.f32 %v592_v41  ;;  %v593_v45 = vadd.f32 1.0, %v1828_v42  ;;  %v1796_v40 = vld [vmem:[%s2466_s10 + $0x198] sm:$0xff]   ;;  %v1797_v41 = vld [vmem:[%s2466_s10 + $0x160] sm:$0xff]  }
 0x336   :  { %v1832_v46 = vpop.eup %1831  ;;  %1849 = vrcp.f32 %v594_v43  ;;  %v595_v47 = vadd.f32 1.0, %v1830_v44  ;;  %v1798_v43 = vld [vmem:[%s2466_s10 + $0x1e0] sm:$0xff]  }
 0x337   :  { %v1834_v48 = vpop.eup %1833  ;;  %1851 = vrcp.f32 %v593_v45  ;;  %v588_v49 = vadd.f32 1.0, %v1832_v46  ;;  %v1799_v45 = vld [vmem:[%s2466_s10 + $0x120] sm:$0xff]  }
 0x338   :  { %v1836_v50 = vpop.eup %1835  ;;  %1853 = vrcp.f32 %v595_v47  ;;  %v590_v51 = vadd.f32 1.0, %v1834_v48  ;;  %v1800_v47 = vld [vmem:[%s2466_s10 + $0x1a0] sm:$0xff]   ;;  %v1801_v48 = vld [vmem:[%s2466_s10 + $0x168] sm:$0xff]  }
 0x339   :  { %v1838_v52 = vpop.eup %1837  ;;  %1855 = vrcp.f32 %v588_v49  ;;  %v589_v53 = vadd.f32 1.0, %v1836_v50  ;;  %v1802_v50 = vld [vmem:[%s2466_s10 + $0x1e8] sm:$0xff]  }
 0x33a   :  { %1857 = vrcp.f32 %v590_v51  ;;  %v591_v54 = vadd.f32 1.0, %v1838_v52  ;;  %v1803_v51 = vld [vmem:[%s2466_s10 + $0x128] sm:$0xff]  }
 0x33b   :  { %v1840_v56 = vpop.eup %1839  ;;  %1859 = vrcp.f32 %v589_v53  ;;  %v1804_v53 = vld [vmem:[%s2466_s10 + $0x1a8] sm:$0xff]  }
 0x33c   :  { %v1842_v59 = vpop.eup %1841  ;;  %632 = vst [vmem:[#allocation5] sm:$0xff] %v1840_v56  ;;  %1861 = vrcp.f32 %v591_v54  ;;  %v648_v7 = vpack.c.bf16 %v1840_v56, %v640_v61  ;;  %v1805_v54 = vld [vmem:[%s2466_s10 + $0x170] sm:$0xff]   ;;  %v1809_v61 = vld [vmem:[%s2466_s10 + $0x178] sm:$0xff]  }
 0x33d   :  { %v1844_v62 = vpop.eup %1843  ;;  %634 = vst [vmem:[#allocation5 + $0x10] sm:$0xff] %v1842_v59  ;;  %v650_v13 = vpack.c.bf16 %v1842_v59, %v642_v63  ;;  %1863 = vpow2.f32 %v1521_v1  ;;  %v1806_v56 = vld [vmem:[%s2466_s10 + $0x1f0] sm:$0xff]   ;;  %v1811_v63 = vld [vmem:[%s2466_s10 + $0x138] sm:$0xff]   ;;  %v644_v1 = vld [vmem:[%s2478_s4 + $0x20] sm:$0xff] }
 0x33e   :  { %v1846_v0 = vpop.eup %1845  ;;  %633 = vst [vmem:[#allocation5 + $0x8] sm:$0xff] %v1844_v62  ;;  %v649_v2 = vpack.c.bf16 %v1844_v62, %v641_v58  ;;  %1865 = vpow2.f32 %v1523_v5  ;;  %v1807_v58 = vld [vmem:[%s2466_s10 + $0x130] sm:$0xff]   ;;  %v1810_v62 = vld [vmem:[%s2466_s10 + $0x1f8] sm:$0xff]  }
 0x33f   :  { %v1848_v4 = vpop.eup %1847  ;;  %635 = vst [vmem:[#allocation5 + $0x18] sm:$0xff] %v1846_v0  ;;  %v651_v6 = vpack.c.bf16 %v1846_v0, %v643_v60  ;;  %1867 = vpow2.f32 %v1520_v26  ;;  %v1808_v60 = vld [vmem:[%s2466_s10 + $0x1b0] sm:$0xff]   ;;  %v1812_v0 = vld [vmem:[%s2466_s10 + $0x1b8] sm:$0xff]  }
 0x340   :  { %v1850_v12 = vpop.eup %1849  ;;  %1215 = vmatprep.mubr.bf16.mxu1 %v649_v2  ;;  %v656_v31 = vpack.c.bf16 %v1848_v4, %v1848_v4  ;;  %1869 = vpow2.f32 %v1522_v28 }
 0x341   :  { %v1852_v15 = vpop.eup %1851  ;;  %1263 = vmatprep.mubr.bf16.mxu0 %v651_v6  ;;  %1216 = vmatmul.mubr.bf16.vlgmr.msra.gmra.mrb[12].mxu1 %v648_v7  ;;  %v658_v34 = vpack.c.bf16 %v1850_v12, %v1850_v12 }
 0x342   :  { %v1854_v17 = vpop.eup %1853  ;;  %1264 = vmatmul.mubr.bf16.vlgmr.msra.gmra.mrb[12].mxu0 %v650_v13  ;;  %1659 = vmatpush3.bf16.msra.mxu1 %v1783_v3  ;;  %v657_v19 = vpack.c.bf16 %v1852_v15, %v1852_v15  ;;  %v646_v3 = vld [vmem:[%s2478_s4 + $0x30] sm:$0xff] }
 0x343   :  { %v2305_v21 = vpop.eup %1855  ;;  %1687 = vmatpush3.bf16.msra.mxu0 %v1784_v10  ;;  %v659_v22 = vpack.c.bf16 %v1854_v17, %v1854_v17  ;;  %1660 = vmatprep.subr.bf16.mxu1 %v1785_v11  ;;  %v1524_v17 = vld [vmem:[%s2467_s11] ss:$0 sm:$0xff] }
 0x344   :  { %v2313_v23 = vpop.eup %1857  ;;  %636 = vst [vmem:[#allocation5 + $0x20] sm:$0xff] %v2305_v21  ;;  %1223 = vmatprep.mubr.bf16.mxu1 %v657_v19  ;;  %1688 = vmatprep.subr.bf16.mxu0 %v1786_v14  ;;  %v652_v5 = vpack.c.bf16 %v2305_v21, %v644_v1 }
 0x345   :  { %v1860_v25 = vpop.eup %1859  ;;  %638 = vst [vmem:[#allocation5 + $0x30] sm:$0xff] %v2313_v23  ;;  %1271 = vmatprep.mubr.bf16.mxu0 %v659_v22  ;;  %v654_v6 = vpack.c.bf16 %v2313_v23, %v646_v3 }
 0x346   :  { %v1862_v27 = vpop.eup %1861  ;;  %637 = vst [vmem:[#allocation5 + $0x28] sm:$0xff] %v1860_v25  ;;  %1661 = vmatpush3.bf16.msra.mxu1 %v1787_v20  ;;  %v653_v36 = vpack.c.bf16 %v1860_v25, %v645_v30 }
 0x347   :  { %639 = vst [vmem:[#allocation5 + $0x38] sm:$0xff] %v1862_v27  ;;  %1689 = vmatpush3.bf16.msra.mxu0 %v1788_v8  ;;  %1662 = vmatprep.subr.bf16.mxu1 %v1789_v9  ;;  %v655_v38 = vpack.c.bf16 %v1862_v27, %v647_v33  ;;  %v1864_v42 = vpop.eup %1863 }
 0x348   :  { %1690 = vmatprep.subr.bf16.mxu0 %v1790_v24  ;;  %v1866_v44 = vpop.eup %1865  ;;  %v597_v46 = vadd.f32 1.0, %v1864_v42 }
 0x349   :  { %1224 = vmatmul.mubr.bf16.gmra.mrb[16].mxu1 %v656_v31  ;;  %v599_v49 = vadd.f32 1.0, %v1866_v44  ;;  %v1868_v52 = vpop.eup %1867 }
 0x34a   :  { %1272 = vmatmul.mubr.bf16.gmra.mrb[16].mxu0 %v658_v34  ;;  %1663 = vmatpush3.bf16.msra.mxu1 %v1791_v29  ;;  %1871 = vrcp.f32 %v597_v46  ;;  %v1870_v55 = vpop.eup %1869  ;;  %v596_v57 = vadd.f32 1.0, %v1868_v52 }
 0x34b   :  { %1691 = vmatpush3.bf16.msra.mxu0 %v1792_v32  ;;  %1311 = vmatprep.mubr.bf16.mxu1 %v653_v36  ;;  %1873 = vrcp.f32 %v599_v49  ;;  %v598_v59 = vadd.f32 1.0, %v1870_v55 }
 0x34c   :  { %1359 = vmatprep.mubr.bf16.mxu0 %v655_v38  ;;  %1664 = vmatprep.subr.bf16.mxu1 %v1793_v35  ;;  %1875 = vrcp.f32 %v596_v57  ;;  %v1589_v57 = vld [vmem:[%s2468_s12] ss:$0 sm:$0xff]  ;;  %s1965_s12 = smov [#allocation5]  }
 0x34d   :  { %1692 = vmatprep.subr.bf16.mxu0 %v1794_v37  ;;  %1877 = vrcp.f32 %v598_v59  ;;  %s1447_s5 = sshll.u32 %s1965_s12, 4  ;;  %s1448_s5 = int_to_ptr.vmem [resolvable:$true] %s1447_s5 }
 0x34e   :  { %1665 = vmatpush3.bf16.msra.mxu1 %v1795_v39  ;;  %s1891_s30 = scalar_lea.vmem %s1448_s5, 1024  ;;  %p1896_p1 = scmp.lt.s32.totalorder %s1448_s5, %s1448_s5 }
 0x34f   :  { %1693 = vmatpush3.bf16.msra.mxu0 %v1796_v40  ;;  %1666 = vmatprep.subr.bf16.mxu1 %v1797_v41  ;;  %p1892_p0 = scmp.ne.s32.totalorder %s1448_s5, %s1891_s30  ;;  %p1897_p2 = scmp.lt.s32.totalorder %s1891_s30, %s1891_s30 }
 0x350   :  { %1694 = vmatprep.subr.bf16.mxu0 %v1798_v43 }
 0x351   :  { %p1898_p3 = por %p1897_p2, %p1896_p1 }
 0x352   :  { %1667 = vmatpush3.bf16.msra.mxu1 %v1799_v45 }
 0x353   :  { %1695 = vmatpush3.bf16.msra.mxu0 %v1800_v47  ;;  %1668 = vmatprep.subr.bf16.mxu1 %v1801_v48  ;;  %p1899_p4 = pnand %p1898_p3, %p1892_p0 }
 0x354   :  { %1696 = vmatprep.subr.bf16.mxu0 %v1802_v50  ;;  %v1872_v2 = vpop.eup %1871 }
 0x355   :  { %v1874_v4 = vpop.eup %1873  ;;  %v661_v7 = vpack.c.bf16 %v1872_v2, %v1872_v2 }
 0x356   :  { %1669 = vmatpush3.bf16.msra.mxu1 %v1803_v51  ;;  %v663_v10 = vpack.c.bf16 %v1874_v4, %v1874_v4  ;;  %v1876_v11 = vpop.eup %1875 }
 0x357   :  { %1697 = vmatpush3.bf16.msra.mxu0 %v1804_v53  ;;  %1670 = vmatprep.subr.bf16.mxu1 %v1805_v54  ;;  %v1878_v12 = vpop.eup %1877  ;;  %v660_v13 = vpack.c.bf16 %v1876_v11, %v1876_v11 }
 0x358   :  { %1698 = vmatprep.subr.bf16.mxu0 %v1806_v56  ;;  %v662_v14 = vpack.c.bf16 %v1878_v12, %v1878_v12 }
 0x35a   :  { %1671 = vmatpush3.bf16.msra.mxu1 %v1807_v58 }
 0x35b   :  { %1699 = vmatpush3.bf16.msra.mxu0 %v1808_v60  ;;  %1672 = vmatprep.subr.bf16.mxu1 %v1809_v61 }
 0x35c   :  { %1700 = vmatprep.subr.bf16.mxu0 %v1810_v62 }
 0x35e   :  { %1673 = vmatpush3.bf16.msra.mxu1 %v1811_v63 }
 0x35f   :  { %1701 = vmatpush3.bf16.msra.mxu0 %v1812_v0 }
 0x361   :  { %1312 = vmatmul.mubr.bf16.vlgmr.msra.gmra.mrb[20].mxu1 %v652_v5 }
 0x362   :  { %1360 = vmatmul.mubr.bf16.vlgmr.msra.gmra.mrb[20].mxu0 %v654_v6  ;;  %1319 = vmatprep.mubr.bf16.mxu1 %v661_v7 }
 0x363   :  { %1367 = vmatprep.mubr.bf16.mxu0 %v663_v10 }
 0x369   :  { %1320 = vmatmul.mubr.bf16.gmra.mrb[24].mxu1 %v660_v13 }
 0x36a   :  { %1368 = vmatmul.mubr.bf16.gmra.mrb[24].mxu0 %v662_v14 }
 0x414   :  { %v1618_v15 = vpop.f32.mrb[12].mxu1 }
 0x415   :  { %v1646_v16 = vpop.f32.mrb[12].mxu0  ;;  %v1619_v18 = vpop.f32.mrb[13].mxu1 }
 0x416   :  { %v1620_v19 = vadd.f32 %v1619_v18, %v1618_v15  ;;  %v1647_v20 = vpop.f32.mrb[13].mxu0  ;;  %v1621_v21 = vpop.f32.mrb[14].mxu1 }
 0x417   :  { %v1648_v22 = vadd.f32 %v1647_v20, %v1646_v16  ;;  %v1649_v8 = vpop.f32.mrb[14].mxu0  ;;  %v1622_v9 = vpop.f32.mrb[15].mxu1 }
 0x418   :  { %v1218_v23 = vadd.f32 %v1620_v19, %v1524_v17  ;;  %v1623_v24 = vadd.f32 %v1622_v9, %v1621_v21  ;;  %v1650_v25 = vpop.f32.mrb[15].mxu0 }
 0x419   :  { %v1651_v26 = vadd.f32 %v1650_v25, %v1649_v8 }
 0x41a   :  { %v1266_v27 = vadd.f32 %v1648_v22, %v1218_v23  ;;  %v1221_v28 = vadd.f32 %v1623_v24, %v1524_v17 }
 0x41c   :  { %v1269_v29 = vadd.f32 %v1651_v26, %v1221_v28  ;;  %v1624_v30 = vpop.f32.mrb[16].mxu1 }
 0x41d   :  { %v1652_v31 = vpop.f32.mrb[16].mxu0  ;;  %v1625_v32 = vpop.f32.mrb[17].mxu1 }
 0x41e   :  { %v1626_v33 = vadd.f32 %v1625_v32, %v1624_v30  ;;  %v1653_v34 = vpop.f32.mrb[17].mxu0  ;;  %v1627_v35 = vpop.f32.mrb[18].mxu1 }
 0x41f   :  { %v1654_v36 = vadd.f32 %v1653_v34, %v1652_v31  ;;  %v1655_v37 = vpop.f32.mrb[18].mxu0  ;;  %v1628_v38 = vpop.f32.mrb[19].mxu1 }
 0x420   :  { %v1226_v39 = vadd.f32 %v1626_v33, %v1524_v17  ;;  %v1656_v40 = vpop.f32.mrb[19].mxu0 }
 0x422   :  { %v1274_v41 = vadd.f32 %v1654_v36, %v1226_v39 }
 0x434   :  { %v1674_v42 = vpop.f32.mrb[20].mxu1 }
 0x435   :  { %v1702_v43 = vpop.f32.mrb[20].mxu0  ;;  %v1675_v44 = vpop.f32.mrb[21].mxu1 }
 0x436   :  { %v1676_v45 = vadd.f32 %v1675_v44, %v1674_v42  ;;  %v1703_v46 = vpop.f32.mrb[21].mxu0  ;;  %v1677_v47 = vpop.f32.mrb[22].mxu1 }
 0x437   :  { %v1704_v48 = vadd.f32 %v1703_v46, %v1702_v43  ;;  %v1705_v49 = vpop.f32.mrb[22].mxu0  ;;  %v1678_v50 = vpop.f32.mrb[23].mxu1 }
 0x438   :  { %v1314_v51 = vadd.f32 %v1676_v45, %v1266_v27  ;;  %v1679_v52 = vadd.f32 %v1678_v50, %v1677_v47  ;;  %v1706_v53 = vpop.f32.mrb[23].mxu0 }
 0x439   :  { %v1707_v54 = vadd.f32 %v1706_v53, %v1705_v49 }
 0x43a   :  { %v1362_v55 = vadd.f32 %v1704_v48, %v1314_v51  ;;  %v1317_v56 = vadd.f32 %v1679_v52, %v1269_v29 }
 0x43c   :  { %v1375_v58 = vmax.f32 %v1362_v55, 0.0  ;;  %v1365_v59 = vadd.f32 %v1707_v54, %v1317_v56  ;;  %v1680_v60 = vpop.f32.mrb[24].mxu1 }
 0x43d   :  { %v1708_v61 = vpop.f32.mrb[24].mxu0  ;;  %v1681_v62 = vpop.f32.mrb[25].mxu1 }
 0x43e   :  { %1378 = vst.msk [vmem:[#allocation7] sm:$0xff] %vm97_vm1, %v1375_v58  ;;  %v1376_v63 = vmax.f32 %v1365_v59, 0.0  ;;  %v1682_v0 = vadd.f32 %v1681_v62, %v1680_v60  ;;  %v1709_v1 = vpop.f32.mrb[25].mxu0  ;;  %v1683_v2 = vpop.f32.mrb[26].mxu1  ;;  %v1387_v3 = vmul.f32 %v1589_v57, %v1375_v58 }
 0x43f   :  { %v1710_v4 = vadd.f32 %v1709_v1, %v1708_v61  ;;  %v1711_v5 = vpop.f32.mrb[26].mxu0  ;;  %v1684_v6 = vpop.f32.mrb[27].mxu1 }
 0x440   :  { %1379 = vst.msk [vmem:[#allocation7 + $0x8] sm:$0xff] %vm97_vm1, %v1376_v63  ;;  %v1322_v7 = vadd.f32 %v1682_v0, %v1274_v41  ;;  %v1712_v10 = vpop.f32.mrb[27].mxu0  ;;  %v1390_v11 = vsel %vm97_vm1, %v1387_v3, 0.0  ;;  %v1388_v12 = vmul.f32 %v1589_v57, %v1376_v63 }
 0x441   :  { %1391 = vadd.xlane.f32.xlu0 %v1390_v11 }
 0x442   :  { %v1370_v13 = vadd.f32 %v1710_v4, %v1322_v7  ;;  %v1393_v14 = vsel %vm97_vm1, %v1388_v12, 0.0 }
 0x443   :  { %1394 = vadd.xlane.f32.xlu1 %v1393_v14 }
 0x444   :  { %v1377_v15 = vmax.f32 %v1370_v13, 0.0 }
 0x446   :  { %v1389_v16 = vmul.f32 %v1589_v57, %v1377_v15 }
 0x448   :  { %v1396_v17 = vsel %vm97_vm1, %v1389_v16, 0.0 }
 0x449   :  { %1397 = vadd.xlane.f32.xlu1 %v1396_v17 }
 0x44a   :  { %1902 = shalt.err (!%p1899_p4)
}
 0x44b   :  { %s1903_s1 = scalar_lea.hbm %s2471_s15, 1024 }
 0x44c   :  { %p1904_p5 = scmp.ne.s32.totalorder %s2471_s15, %s1903_s1  ;;  %p1907_p6 = scmp.lt.u32.totalorder %s1903_s1, %s2471_s15 }
 0x44e   :  { %p1909_p7 = pnand %p1907_p6, %p1904_p5 }
 0x450   :  { %1912 = shalt.err (!%p1909_p7)
}
 0x451   :  { %1450 = dma.vmem_to_hbm [thread:$0]  %s1448_s5, 1024, %s2471_s15, [#allocation6]  }
 0x452   :  { %s1913_s2 = scalar_lea.vmem %s1438_s13, 128  ;;  %p1918_p9 = scmp.lt.s32.totalorder %s1438_s13, %s1438_s13 }
 0x453   :  { %p1914_p8 = scmp.ne.s32.totalorder %s1438_s13, %s1913_s2  ;;  %p1919_p10 = scmp.lt.s32.totalorder %s1913_s2, %s1913_s2 }
 0x455   :  { %p1920_p11 = por %p1919_p10, %p1918_p9 }
 0x457   :  { %p1921_p12 = pnand %p1920_p11, %p1914_p8 }
 0x459   :  { %1924 = shalt.err (!%p1921_p12)
}
 0x45a   :  { %s1925_s8 = scalar_lea.hbm %s2470_s14, 128 }
 0x45b   :  { %p1926_p13 = scmp.ne.s32.totalorder %s2470_s14, %s1925_s8  ;;  %p1929_p0 = scmp.lt.u32.totalorder %s1925_s8, %s2470_s14 }
 0x45d   :  { %p1931_p1 = pnand %p1929_p0, %p1926_p13 }
 0x45f   :  { %1934 = shalt.err (!%p1931_p1)
}
 0x460   :  { %1440 = dma.vmem_to_hbm [thread:$0]  %s1438_s13, 128, %s2470_s14, [#allocation4]  }
 0x461   :  { %s1967_s10 = smov [#allocation7]  }
 0x462   :  { %s1456_s4 = sshll.u32 %s1967_s10, 4  ;;  %s1457_s4 = int_to_ptr.vmem [resolvable:$true] %s1456_s4 }
 0x463   :  { %s1935_s11 = scalar_lea.vmem %s1457_s4, 256  ;;  %p1940_p3 = scmp.lt.s32.totalorder %s1457_s4, %s1457_s4 }
 0x464   :  { %p1936_p2 = scmp.ne.s32.totalorder %s1457_s4, %s1935_s11  ;;  %p1941_p4 = scmp.lt.s32.totalorder %s1935_s11, %s1935_s11 }
 0x466   :  { %p1942_p5 = por %p1941_p4, %p1940_p3 }
 0x468   :  { %p1943_p6 = pnand %p1942_p5, %p1936_p2 }
 0x46a   :  { %1946 = shalt.err (!%p1943_p6)
}
 0x46b   :  { %s1947_s5 = scalar_lea.hbm %s2472_s16, 256 }
 0x46c   :  { %p1948_p7 = scmp.ne.s32.totalorder %s2472_s16, %s1947_s5  ;;  %p1951_p8 = scmp.lt.u32.totalorder %s1947_s5, %s2472_s16 }
 0x46e   :  { %p1953_p9 = pnand %p1951_p8, %p1948_p7 }
 0x470   :  { %1956 = shalt.err (!%p1953_p9)
}
 0x471   :  { %s1968_s13 = smov 128   ;;  %s1969_s19 = smov 8   ;;  %v1590_v18 = vld [vmem:[#allocation2] ss:$0 sm:$0xff]  ;;  %vm1427_vm3 = vcmask 7168  }
 0x472   :  { %1462 = dma.vmem_to_hbm [thread:$0]  %s1457_s4, 256, %s2472_s16, [#allocation6], %s1968_s13, %s1968_s13, %s1969_s19  }
 0x4ce   :  { %v1392_v19 = vpop.xlane.xlu0 %1391 }
 0x4cf   :  { %v1406_v20 = vadd.f32 %v1590_v18, %v1392_v19 }
 0x4d0   :  { %v1395_v21 = vpop.xlane.xlu1 %1394 }
 0x4d1   :  { %v1591_v22 = vmul.f32 -1.442695, %v1406_v20  ;;  %v1407_v8 = vadd.f32 %v1590_v18, %v1395_v21 }
 0x4d3   :  { %1879 = vpow2.f32 %v1591_v22  ;;  %v1592_v9 = vmul.f32 -1.442695, %v1407_v8 }
 0x4d5   :  { %1881 = vpow2.f32 %v1592_v9 }
 0x4d6   :  { %v1398_v23 = vpop.xlane.xlu1 %1397 }
 0x4d7   :  { %v1408_v24 = vadd.f32 %v1590_v18, %v1398_v23 }
 0x4d9   :  { %v1593_v25 = vmul.f32 -1.442695, %v1408_v24 }
 0x4db   :  { %1883 = vpow2.f32 %v1593_v25 }
 0x4dd   :  { %v1880_v26 = vpop.eup %1879 }
 0x4de   :  { %v1418_v27 = vadd.f32 1.0, %v1880_v26 }
 0x4df   :  { %v1882_v28 = vpop.eup %1881 }
 0x4e0   :  { %1885 = vrcp.f32 %v1418_v27  ;;  %v1419_v29 = vadd.f32 1.0, %v1882_v28 }
 0x4e2   :  { %1887 = vrcp.f32 %v1419_v29 }
 0x4e5   :  { %v1884_v30 = vpop.eup %1883 }
 0x4e6   :  { %v1420_v31 = vadd.f32 1.0, %v1884_v30 }
 0x4e8   :  { %1889 = vrcp.f32 %v1420_v31 }
 0x4ea   :  { %v1886_v32 = vpop.eup %1885 }
 0x4eb   :  { %1428 = vst.msk [vmem:[%s2473_s17] sm:$0xff] %vm1427_vm3, %v1886_v32 }
 0x4ec   :  { %v1888_v33 = vpop.eup %1887 }
 0x4ed   :  { %1429 = vst.msk [vmem:[%s2473_s17 + $0x8] sm:$0xff] %vm1427_vm3, %v1888_v33 }
 0x4f2   :  { %v1890_v34 = vpop.eup %1889 }
 0x4f3   :  { %1430 = vst.msk [vmem:[%s2473_s17 + $0x10] sm:$0xff] %vm1427_vm3, %v1890_v34 }
 0x4f4   :  { %1957 = dma.done.wait [#allocation4], 128  }
 0x4f5   :  { %1958 = vsyncadd [#allocation4], 4294967168 }
 0x4f6   :  { %1959 = dma.done.wait [#allocation6], 1280  }
 0x4f7   :  { %1960 = vsyncadd [#allocation6], 4294966016 }
 0x4f8   :  { %1476 = vsyncpa [#allocation4], 1 }
 0x4f9   :  { %1477 = vsyncpa [#allocation6], 1 }

</bundles_post_ra>
